<compile_context>
chip_gen: v7x
topology: tpu7x:2x2x1
jax: 0.10.0
libtpu: 0.0.40
codegen_flags: <defaults>
</compile_context>

<pallas_src>
import functools

import jax
import jax.numpy as jnp
from jax.experimental import pallas as pl
from jax.experimental.pallas import tpu as pltpu

_LANE = 128


def _round_up(n, m):
    return ((n + m - 1) // m) * m


def gated_head_kernel(x_ref, w_ref, b_ref, o_ref):
    # x_ref: (TILE_B, F), w_ref: (F, 2*Cp), b_ref: (1, 2*Cp), o_ref: (TILE_B, Cp)
    cp = o_ref.shape[-1]
    # Single fused matmul on the MXU, f32 accumulation.
    z = jnp.dot(x_ref[...], w_ref[...], preferred_element_type=jnp.float32)
    z = z + b_ref[...]                       # (TILE_B, 2*Cp), f32
    act = jax.nn.sigmoid(z[:, :cp])          # lane-aligned split (Cp % 128 == 0)
    gate = jax.nn.sigmoid(z[:, cp:])
    o_ref[...] = (act * gate).astype(o_ref.dtype)


def prepare_gated_head_params(weight, bias, num_classes, compute_dtype=jnp.float32):
    """One-time parameter prep (do NOT call per forward pass).

    Builds the fused, transposed, lane-padded weight (F, 2*Cp) and bias
    (1, 2*Cp).  Columns [:Cp] are the 'act' half, [Cp:] the 'gate' half;
    padded columns are zero (their outputs are sliced away).
    """
    c = num_classes
    two_c, f = weight.shape
    assert two_c == 2 * c, "weight must be (2*num_classes, num_features)"
    cp = max(_LANE, _round_up(c, _LANE))

    w_fused = jnp.zeros((f, 2 * cp), dtype=compute_dtype)
    w_fused = w_fused.at[:, :c].set(weight[:c, :].T.astype(compute_dtype))
    w_fused = w_fused.at[:, cp:cp + c].set(weight[c:, :].T.astype(compute_dtype))

    b_fused = jnp.zeros((1, 2 * cp), dtype=jnp.float32)
    b_fused = b_fused.at[0, :c].set(bias[:c].astype(jnp.float32))
    b_fused = b_fused.at[0, cp:cp + c].set(bias[c:].astype(jnp.float32))
    return w_fused, b_fused, cp


def gated_head_apply(x, w_fused, b_fused, num_classes, *, tile_b=None,
                     compute_dtype=None):
    """x: (B, F). w_fused: (F, 2*Cp), b_fused: (1, 2*Cp). Returns (B, C)."""
    b_sz, f = x.shape
    cp = w_fused.shape[1] // 2
    out_dtype = x.dtype
    if compute_dtype is not None and x.dtype != compute_dtype:
        x = x.astype(compute_dtype)  # e.g. bf16 MXU path; accumulation stays f32

    x_isz = jnp.dtype(x.dtype).itemsize
    o_isz = jnp.dtype(out_dtype).itemsize
    w_bytes = 2 * (w_fused.size * jnp.dtype(w_fused.dtype).itemsize
                   + b_fused.size * jnp.dtype(b_fused.dtype).itemsize)

    if tile_b is None:
        # Size the batch tile against a ~24 MiB working-set budget so the
        # double-buffered pipeline fits comfortably on v7x's 64 MiB VMEM as
        # well as the default scoped limits on v5e/v6e.
        budget = 24 * 1024 * 1024 - w_bytes
        per_row = 2 * (f * x_isz + cp * o_isz) + 2 * cp * 4   # x/out bufs + z
        tile_b = budget // max(per_row, 1)
        tile_b = int(max(8, min(1024, (tile_b // 8) * 8)))
    if b_sz <= tile_b:
        tile_b = b_sz   # single full-extent block is always a legal block shape
    # NOTE: for very large F (weight alone exceeding the VMEM budget) the
    # right extension is a K grid axis with an f32 accumulator scratch and
    # pl.when init/finalize; not needed at these head-sized shapes.

    vmem_need = (2 * tile_b * f * x_isz
                 + 2 * tile_b * cp * o_isz
                 + tile_b * 2 * cp * 4
                 + w_bytes)
    vmem_limit = int(min(max(32 * 1024 * 1024, vmem_need + 8 * 1024 * 1024),
                         64 * 1024 * 1024))

    out_padded = pl.pallas_call(
        gated_head_kernel,
        out_shape=jax.ShapeDtypeStruct((b_sz, cp), out_dtype),
        grid=(pl.cdiv(b_sz, tile_b),),
        in_specs=[
            pl.BlockSpec((tile_b, f), lambda i: (i, 0)),       # x: tiled over batch
            pl.BlockSpec((f, 2 * cp), lambda i: (0, 0)),       # weight: VMEM-resident
            pl.BlockSpec((1, 2 * cp), lambda i: (0, 0)),       # bias:   VMEM-resident
        ],
        out_specs=pl.BlockSpec((tile_b, cp), lambda i: (i, 0)),
        compiler_params=pltpu.CompilerParams(
            dimension_semantics=("parallel",),   # megacore sharding on v7x
            vmem_limit_bytes=vmem_limit,
        ),
    )(x, w_fused, b_fused)

    return out_padded[:, :num_classes]


def gated_head(x, weight, bias, num_classes, compute_dtype=jnp.float32):
    """Convenience wrapper matching the original signature (prep + apply)."""
    w_fused, b_fused, _ = prepare_gated_head_params(
        weight, bias, num_classes, compute_dtype=compute_dtype)
    return gated_head_apply(x, w_fused, b_fused, num_classes,
                            compute_dtype=compute_dtype)


def gated_head_ref(x, weight, bias, num_classes):
    """Pure-JAX reference matching the PyTorch module exactly."""
    z = x @ weight.T + bias
    return jax.nn.sigmoid(z[:, :num_classes]) * jax.nn.sigmoid(z[:, num_classes:])


if __name__ == "__main__":
    B = 8    # batch
    F = 32   # num_features
    C = 16   # num_classes

    key = jax.random.PRNGKey(0)
    kx, kw, kb = jax.random.split(key, 3)

    x = jax.random.normal(kx, (B, F), dtype=jnp.float32)
    weight = jax.random.normal(kw, (2 * C, F), dtype=jnp.float32) * 0.1
    bias = jax.random.normal(kb, (2 * C,), dtype=jnp.float32) * 0.1

    # Prep the fused / transposed / lane-padded parameters ONCE (hot-path
    # calls then reuse them instead of re-transposing per call).
    w_fused, b_fused, _ = prepare_gated_head_params(weight, bias, C)

    fwd = jax.jit(functools.partial(gated_head_apply, num_classes=C))
    out = fwd(x, w_fused, b_fused)
    out = jax.block_until_ready(out)

    ref = gated_head_ref(x, weight, bias, C)
    assert out.shape == (B, C)
    assert jnp.allclose(out, ref, atol=1e-5, rtol=1e-5), "mismatch vs reference"

    print("KERNEL_OK")
</pallas_src>

<mosaic_0001>
module attributes {stable_mosaic.version = 11 : i64} {
  func.func @gated_head_kernel(%arg0: i32, %arg1: memref<8x32xf32, #tpu.memory_space<vmem>>, %arg2: memref<32x256xf32, #tpu.memory_space<vmem>>, %arg3: memref<1x256xf32, #tpu.memory_space<vmem>>, %arg4: memref<8x128xf32, #tpu.memory_space<vmem>>) attributes {dimension_semantics = [#tpu.dimension_semantics<parallel>], iteration_bounds = array<i64: 1>, scalar_prefetch = 0 : i64, scratch_operands = 0 : i64, tpu.core_type = #tpu.core_type<tc>, window_params = [{transform_indices = @transform_0, window_bounds = array<i64: 8, 32>}, {pipeline_mode = #tpu.pipeline_mode<synchronous>, transform_indices = @transform_1, window_bounds = array<i64: 32, 256>}, {pipeline_mode = #tpu.pipeline_mode<synchronous>, transform_indices = @transform_2, window_bounds = array<i64: 1, 256>}, {transform_indices = @transform_3, window_bounds = array<i64: 8, 128>}]} {
    %c0 = arith.constant 0 : index
    %c0_0 = arith.constant 0 : index
    %0 = vector.load %arg1[%c0, %c0_0] : memref<8x32xf32, #tpu.memory_space<vmem>>, vector<8x32xf32>
    %c0_1 = arith.constant 0 : index
    %c0_2 = arith.constant 0 : index
    %1 = vector.load %arg2[%c0_1, %c0_2] : memref<32x256xf32, #tpu.memory_space<vmem>>, vector<32x256xf32>
    %cst = arith.constant dense<0.000000e+00> : vector<8x256xf32>
    %2 = tpu.matmul %0, %1, %cst {dimension_numbers = #tpu.dot_dimension_numbers<[1], [0], [0], [1], [0, 0, 1, 1], [], []>} : vector<8x32xf32>, vector<32x256xf32>, vector<8x256xf32> -> vector<8x256xf32>
    %c0_3 = arith.constant 0 : index
    %c0_4 = arith.constant 0 : index
    %3 = vector.load %arg3[%c0_3, %c0_4] : memref<1x256xf32, #tpu.memory_space<vmem>>, vector<1x256xf32>
    %4 = vector.broadcast %3 : vector<1x256xf32> to vector<8x256xf32>
    %5 = arith.addf %2, %4 : vector<8x256xf32>
    %6 = vector.extract_strided_slice %5 {offsets = [0, 0], sizes = [8, 128], strides = [1, 1]} : vector<8x256xf32> to vector<8x128xf32>
    %7 = arith.negf %6 : vector<8x128xf32>
    %8 = math.exp %7 : vector<8x128xf32>
    %cst_5 = arith.constant 1.000000e+00 : f32
    %9 = vector.broadcast %cst_5 : f32 to vector<8x128xf32>
    %10 = arith.addf %9, %8 : vector<8x128xf32>
    %11 = arith.divf %9, %10 : vector<8x128xf32>
    %12 = vector.extract_strided_slice %5 {offsets = [0, 128], sizes = [8, 128], strides = [1, 1]} : vector<8x256xf32> to vector<8x128xf32>
    %13 = arith.negf %12 : vector<8x128xf32>
    %14 = math.exp %13 : vector<8x128xf32>
    %cst_6 = arith.constant 1.000000e+00 : f32
    %15 = vector.broadcast %cst_6 : f32 to vector<8x128xf32>
    %16 = arith.addf %15, %14 : vector<8x128xf32>
    %17 = arith.divf %15, %16 : vector<8x128xf32>
    %18 = arith.mulf %11, %17 : vector<8x128xf32>
    %c0_7 = arith.constant 0 : index
    %c0_8 = arith.constant 0 : index
    %19 = vector.load %arg4[%c0_7, %c0_8] : memref<8x128xf32, #tpu.memory_space<vmem>>, vector<8x128xf32>
    tpu.vector_store %arg4[%c0_7, %c0_8], %18 {strides = array<i32>} : memref<8x128xf32, #tpu.memory_space<vmem>>, vector<8x128xf32>,
    return
  }
  func.func @transform_0(%arg0: i32) -> (i32, i32) {
    %c0_i32 = arith.constant 0 : i32
    %c0_i32_0 = arith.constant 0 : i32
    return %arg0, %c0_i32 : i32, i32
  }
  func.func @transform_1(%arg0: i32) -> (i32, i32) {
    %c0_i32 = arith.constant 0 : i32
    %c0_i32_0 = arith.constant 0 : i32
    %c0_i32_1 = arith.constant 0 : i32
    return %c0_i32, %c0_i32_0 : i32, i32
  }
  func.func @transform_2(%arg0: i32) -> (i32, i32) {
    %c0_i32 = arith.constant 0 : i32
    %c0_i32_0 = arith.constant 0 : i32
    %c0_i32_1 = arith.constant 0 : i32
    return %c0_i32, %c0_i32_0 : i32, i32
  }
  func.func @transform_3(%arg0: i32) -> (i32, i32) {
    %c0_i32 = arith.constant 0 : i32
    %c0_i32_0 = arith.constant 0 : i32
    return %arg0, %c0_i32 : i32, i32
  }
}

</mosaic_0001>

<bundles_post_ra>
// kernel: gated_head_apply.1
= control target key start
LH: loop header
LB: loop body
LE: loop exit
PB: predicated region body
PF: predicated region fallthrough
CT: control target
= control target key end

     0   :  { %8 = vsyncpa [#allocation3], 0  ;;  %s336_s0 = inlined_call_operand.hbm [shape: f32[8,32], index: 0, kind: input, shape index: {}]   ;;  %s337_s1 = inlined_call_operand.hbm [shape: f32[32,256], index: 1, kind: input, shape index: {}]   ;;  %s338_s2 = inlined_call_operand.vmem [shape: f32[1,256], index: 2, kind: input, shape index: {}]   ;;  %s339_s3 = inlined_call_operand.hbm [shape: f32[8,128], index: 3, kind: output, shape index: {}]  }
   0x1   :  { %9 = vsyncpa [#allocation6], 0 }
   0x2   :  { %10 = vsyncpa [#allocation4], 0  ;;  %s264_s12 = smov [#allocation2]   ;;  %s265_s14 = smov [#allocation5]  }
   0x3   :  { %s17_s13 = sshll.u32 %s264_s12, 4  ;;  %s26_s15 = sshll.u32 %s265_s14, 4  ;;  %s18_s13 = int_to_ptr.vmem [resolvable:$true] %s17_s13  ;;  %s290_s15 = int_to_ptr.vmem [resolvable:$true] %s26_s15 }
   0x4   :  { %s192_s18 = scalar_lea.hbm %s336_s0, 128 }
   0x5   :  { %p193_p0 = scmp.ne.s32.totalorder %s336_s0, %s192_s18  ;;  %p196_p1 = scmp.lt.u32.totalorder %s192_s18, %s336_s0 }
   0x7   :  { %p198_p2 = pnand %p196_p1, %p193_p0 }
   0x9   :  { %201 = shalt.err (!%p198_p2)
}
   0xa   :  { %s202_s23 = scalar_lea.vmem %s18_s13, 128  ;;  %p207_p4 = scmp.lt.s32.totalorder %s18_s13, %s18_s13 }
   0xb   :  { %p203_p3 = scmp.ne.s32.totalorder %s18_s13, %s202_s23  ;;  %p208_p5 = scmp.lt.s32.totalorder %s202_s23, %s202_s23 }
   0xd   :  { %p209_p6 = por %p208_p5, %p207_p4 }
   0xf   :  { %p210_p7 = pnand %p209_p6, %p203_p3 }
  0x11   :  { %213 = shalt.err (!%p210_p7)
}
  0x12   :  { %20 = dma.hbm_to_vmem [thread:$0]  %s336_s0, 128, %s18_s13, [#allocation3]  }
  0x13   :  { %s214_s28 = scalar_lea.hbm %s337_s1, 1024 }
  0x14   :  { %p215_p8 = scmp.ne.s32.totalorder %s337_s1, %s214_s28  ;;  %p218_p9 = scmp.lt.u32.totalorder %s214_s28, %s337_s1 }
  0x16   :  { %p220_p10 = pnand %p218_p9, %p215_p8 }
  0x18   :  { %223 = shalt.err (!%p220_p10)
}
  0x19   :  { %s224_s6 = scalar_lea.vmem %s290_s15, 1024  ;;  %p229_p12 = scmp.lt.s32.totalorder %s290_s15, %s290_s15 }
  0x1a   :  { %p225_p11 = scmp.ne.s32.totalorder %s290_s15, %s224_s6  ;;  %p230_p13 = scmp.lt.s32.totalorder %s224_s6, %s224_s6 }
  0x1c   :  { %p231_p0 = por %p230_p13, %p229_p12 }
  0x1e   :  { %p232_p1 = pnand %p231_p0, %p225_p11 }
  0x20   :  { %235 = shalt.err (!%p232_p1)
}
  0x21   :  { %s266_s0 = smov 256   ;;  %s267_s7 = smov 16  }
  0x22   :  { %32 = dma.hbm_to_vmem [thread:$0]  %s337_s1, 1024, %s290_s15, [#allocation6], %s266_s0, %s266_s0, %s267_s7  }
  0x23   :  { %258 = dma.done.wait [#allocation3], 128  }
  0x24   :  { %259 = vsyncadd [#allocation3], 4294967168 }
  0x25   :  { %260 = dma.done.wait [#allocation6], 1024  }
  0x26   :  { %261 = vsyncadd [#allocation6], 4294966272  ;;  %v268_v0 = vmov 0.0   ;;  %v43_v1 = vld [vmem:[#allocation5 + $0x8] sm:$0xff]  ;;  %v45_v2 = vld [vmem:[#allocation5 + $0x18] sm:$0xff]  ;;  %vm62_vm0 = vcmask 261120   ;;  %v52_v14 = vlaneseq }
  0x27   :  { %130 = vmatprep.mubr.f32.mxu0 %v268_v0  ;;  %v42_v3 = vld [vmem:[#allocation5] sm:$0xff]  ;;  %v170_v4 = vpack.c.bf16 %v45_v2, %v43_v1  ;;  %v44_v5 = vld [vmem:[#allocation5 + $0x10] sm:$0xff]  ;;  %v47_v6 = vld [vmem:[#allocation5 + $0x28] sm:$0xff]  ;;  %s269_s11 = smov [#allocation7]  }
  0x28   :  { %v49_v7 = vld [vmem:[#allocation5 + $0x38] sm:$0xff]  ;;  %v172_v8 = vpack.c.bf16 %v44_v5, %v42_v3  ;;  %v46_v10 = vld [vmem:[#allocation5 + $0x20] sm:$0xff]  ;;  %v48_v11 = vld [vmem:[#allocation5 + $0x30] sm:$0xff]  ;;  %v53_v15 = vshrl.u32 %v52_v14, 7  ;;  %s157_s12 = sshll.u32 %s269_s11, 4  ;;  %s158_s12 = int_to_ptr.vmem [resolvable:$true] %s157_s12 }
  0x29   :  { %v174_v9 = vpack.c.bf16 %v49_v7, %v47_v6  ;;  %171 = vmatprep.subr.bf16.mxu0 %v170_v4  ;;  %v176_v12 = vpack.c.bf16 %v48_v11, %v46_v10  ;;  %v41_v13 = vld [vmem:[#allocation2] sm:$0xff]  ;;  %p241_p3 = scmp.lt.s32.totalorder %s158_s12, %s158_s12 }
  0x2a   :  { %173 = vmatpush1.bf16.msra.mxu0 %v172_v8  ;;  %v54_v16 = vsub.s32 0, %v53_v15  ;;  %v50_v17 = vld [vmem:[%s338_s2] sm:$0x3]  ;;  %v58_v18 = vsub.s32 1, %v53_v15  ;;  %s236_s2 = scalar_lea.vmem %s158_s12, 128 }
  0x2b   :  { %175 = vmatprep.subr.bf16.mxu0 %v174_v9  ;;  %p237_p2 = scmp.ne.s32.totalorder %s158_s12, %s236_s2  ;;  %p242_p4 = scmp.lt.s32.totalorder %s236_s2, %s236_s2 }
  0x2c   :  { %v55_v19 = vrot.slane %v50_v17, %v54_v16  ;;  %v59_v20 = vrot.slane %v50_v17, %v58_v18 }
  0x2d   :  { %p243_p5 = por %p242_p4, %p241_p3 }
  0x2e   :  { %177 = vmatpush1.bf16.msra.mxu0 %v176_v12 }
  0x2f   :  { %p244_p6 = pnand %p243_p5, %p237_p2 }
  0x31   :  { %167 = vmatmul.mubr.msk.f32.vlgmr.msra.gmra.mrb[0].mxu0 %vm62_vm0, %v41_v13 }
 0x104   :  { %v132_v21 = vpop.f32.mrb[0].mxu0 }
 0x105   :  { %v133_v22 = vadd.f32 %v132_v21, %v55_v19  ;;  %v134_v23 = vpop.f32.mrb[1].mxu0 }
 0x106   :  { %v135_v24 = vadd.f32 %v134_v23, %v59_v20 }
 0x107   :  { %v168_v25 = vmul.f32 -1.442695, %v133_v22 }
 0x108   :  { %v169_v26 = vmul.f32 -1.442695, %v135_v24 }
 0x109   :  { %184 = vpow2.f32 %v168_v25 }
 0x10a   :  { %186 = vpow2.f32 %v169_v26 }
 0x113   :  { %v185_v27 = vpop.eup %184 }
 0x114   :  { %v187_v28 = vpop.eup %186  ;;  %v140_v29 = vadd.f32 1.0, %v185_v27 }
 0x115   :  { %v146_v30 = vadd.f32 1.0, %v187_v28 }
 0x116   :  { %188 = vrcp.f32 %v140_v29 }
 0x117   :  { %190 = vrcp.f32 %v146_v30 }
 0x120   :  { %v189_v31 = vpop.eup %188 }
 0x121   :  { %v191_v32 = vpop.eup %190 }
 0x122   :  { %v149_v33 = vmul.f32 %v191_v32, %v189_v31 }
 0x124   :  { %150 = vst [vmem:[#allocation7] sm:$0xff] %v149_v33 }
 0x125   :  { %247 = shalt.err (!%p244_p6)
}
 0x126   :  { %s248_s15 = scalar_lea.hbm %s339_s3, 128 }
 0x127   :  { %p249_p7 = scmp.ne.s32.totalorder %s339_s3, %s248_s15  ;;  %p252_p8 = scmp.lt.u32.totalorder %s248_s15, %s339_s3 }
 0x129   :  { %p254_p9 = pnand %p252_p8, %p249_p7 }
 0x12b   :  { %257 = shalt.err (!%p254_p9)
}
 0x12c   :  { %160 = dma.vmem_to_hbm [thread:$0]  %s158_s12, 128, %s339_s3, [#allocation4]  }
 0x12d   :  { %262 = dma.done.wait [#allocation4], 128  }
 0x12e   :  { %263 = vsyncadd [#allocation4], 4294967168 }
 0x12f   :  { %164 = vsyncpa [#allocation3], 1 }
 0x130   :  { %165 = vsyncpa [#allocation6], 1 }
 0x131   :  { %166 = vsyncpa [#allocation4], 1 }

</bundles_post_ra>
